<compile_context>
chip_gen: v7x
topology: tpu7x:2x2x1
jax: 0.10.0
libtpu: 0.0.40
codegen_flags: <defaults>
</compile_context>

<pallas_src>
import functools

import numpy as np
import jax
import jax.numpy as jnp
from jax.experimental import pallas as pl
from jax.experimental.pallas import tpu as pltpu


# ----------------------------------------------------------------------------
# Deterministic kernel construction (port of get_kernel from modules/unet.py)
# ----------------------------------------------------------------------------
def get_kernel(factor, kernel_type, phase, kernel_width, support=None, sigma=None):
    assert kernel_type in ['lanczos', 'gauss', 'box']
    if phase == 0.5 and kernel_type != 'box':
        kernel = np.zeros([kernel_width - 1, kernel_width - 1])
    else:
        kernel = np.zeros([kernel_width, kernel_width])
    if kernel_type == 'box':
        assert phase == 0.5, 'Box filter is always half-phased'
        kernel[:] = 1.0 / (kernel_width * kernel_width)
    elif kernel_type == 'gauss':
        assert sigma, 'sigma is not specified'
        assert phase != 0.5, 'phase 1/2 for gauss not implemented'
        center = (kernel_width + 1.0) / 2.0
        sigma_sq = sigma * sigma
        for i in range(1, kernel.shape[0] + 1):
            for j in range(1, kernel.shape[1] + 1):
                di = (i - center) / 2.0
                dj = (j - center) / 2.0
                kernel[i - 1][j - 1] = np.exp(-(di * di + dj * dj) / (2 * sigma_sq))
                kernel[i - 1][j - 1] = kernel[i - 1][j - 1] / (2.0 * np.pi * sigma_sq)
    elif kernel_type == 'lanczos':
        assert support, 'support is not specified'
        center = (kernel_width + 1) / 2.0
        for i in range(1, kernel.shape[0] + 1):
            for j in range(1, kernel.shape[1] + 1):
                if phase == 0.5:
                    di = abs(i + 0.5 - center) / factor
                    dj = abs(j + 0.5 - center) / factor
                else:
                    di = abs(i - center) / factor
                    dj = abs(j - center) / factor
                val = 1
                if di != 0:
                    val = val * support * np.sin(np.pi * di) * np.sin(np.pi * di / support)
                    val = val / (np.pi * np.pi * di * di)
                if dj != 0:
                    val = val * support * np.sin(np.pi * dj) * np.sin(np.pi * dj / support)
                    val = val / (np.pi * np.pi * dj * dj)
                kernel[i - 1][j - 1] = val
    else:
        assert False, 'wrong method name'
    kernel /= kernel.sum()
    return kernel


# ----------------------------------------------------------------------------
# Pallas kernel: separable strided downsample of a batch of planes
# ----------------------------------------------------------------------------
def _band_matrix(shape, factor, taps, in_axis):
    """Dense band matrix for a strided 1-D correlation, built on the VPU.

    M[..] = taps[i_in - i_out*factor] where i_in indexes axis `in_axis` and
    i_out indexes the other axis; entries outside the band are zero.
    """
    idx_in = jax.lax.broadcasted_iota(jnp.int32, shape, in_axis)
    idx_out = jax.lax.broadcasted_iota(jnp.int32, shape, 1 - in_axis)
    d = idx_in - idx_out * factor
    m = jnp.zeros(shape, jnp.float32)
    for t, w in enumerate(taps):
        if w == 0.0:
            continue
        m = jnp.where(d == t, jnp.float32(w), m)
    return m


def _downsample_block_kernel(x_ref, o_ref, *, taps, factor, compute_dtype):
    # x_ref: (P, Hp, Wp) f32   P whole planes, W on the lane axis (no relayouts)
    # o_ref: (P, OH, OW) f32
    P, Hp, Wp = x_ref.shape
    _, OH, OW = o_ref.shape

    # Constant band matrices built in-kernel from compile-time tap weights
    # (no mostly-zero HBM operand, no pipelined input buffer for them).
    mh = _band_matrix((Wp, OW), factor, taps, in_axis=0).astype(compute_dtype)
    mv = _band_matrix((OH, Hp), factor, taps, in_axis=1).astype(compute_dtype)

    xb = x_ref[...].astype(compute_dtype)      # f32 DMA, cast on the VPU

    # Horizontal 1-D pass + decimation: one MXU matmul with all P planes
    # flattened into the M dimension (wrapper pads Hp to a multiple of 8 so
    # this reshape is layout-free).
    y = jnp.dot(xb.reshape(P * Hp, Wp), mh, preferred_element_type=jnp.float32)
    y = y.reshape(P, Hp, OW).astype(compute_dtype)

    # Vertical 1-D pass + decimation per plane (P is a small compile-time
    # constant, loop is fully unrolled).
    for p in range(P):
        o_ref[p] = jnp.dot(mv, y[p],
                           preferred_element_type=jnp.float32).astype(o_ref.dtype)


def _pick_vmem_limit_bytes():
    cap = None
    try:
        info = pltpu.get_tpu_info()
        cap = getattr(info, "vmem_capacity_bytes", None)
    except Exception:
        cap = None
    if not cap:
        cap = 64 * 1024 * 1024                      # conservative: v7x per-TC VMEM
    # ~96 MiB on v5e/v6e (128 MiB physical), ~48 MiB on v7x (64 MiB physical).
    return int(min(cap * 3 // 4, 100 * 1024 * 1024))


def downsampler_forward(x_nchw, kernel2d, factor, preserve_size=False, use_bf16=True):
    """Equivalent of Downsampler.forward. x_nchw: (N, C, H, W) float32."""
    N, C, H, W = x_nchw.shape
    K = int(kernel2d.shape[0])

    # Exact 1-D factor of the (separable) normalized 2-D blur kernel; guard the
    # separability assumption so a future non-separable kernel fails loudly.
    k2 = np.asarray(kernel2d, dtype=np.float64)
    k1 = k2.sum(axis=0)
    assert np.allclose(np.outer(k1, k1), k2, rtol=1e-9, atol=1e-12), (
        "Downsampler blur kernel is not an outer product; the separable "
        "Pallas path does not apply.")

    x = x_nchw.astype(jnp.float32)
    if preserve_size:
        # nn.ReplicationPad2d == edge padding (layout glue, plain JAX).
        pad = (K - 1) // 2 if K % 2 == 1 else (K - factor) // 2
        x = jnp.pad(x, ((0, 0), (0, 0), (pad, pad), (pad, pad)), mode='edge')

    Hp, Wp = int(x.shape[2]), int(x.shape[3])
    OH = (Hp - K) // factor + 1
    OW = (Wp - K) // factor + 1

    # Pad rows to a multiple of 8 so the in-kernel (P, Hp, Wp) -> (P*Hp, Wp)
    # flatten is layout-free.  Padded rows never contribute: the vertical band
    # matrix only reaches row (OH-1)*factor + K-1 <= Hp-1.
    Hp8 = -(-Hp // 8) * 8
    if Hp8 != Hp:
        x = jnp.pad(x, ((0, 0), (0, 0), (0, Hp8 - Hp), (0, 0)))

    NC = N * C
    x_r = x.reshape(NC, Hp8, Wp)                    # free reshape; W stays on lanes

    compute_dtype = jnp.bfloat16 if use_bf16 else jnp.float32
    cbytes = 2 if use_bf16 else 4

    vmem_limit = _pick_vmem_limit_bytes()
    budget = vmem_limit // 2                        # headroom for compiler scratch

    def _block_bytes(P):
        in_buf = 2 * P * Hp8 * Wp * 4               # double-buffered f32 input block
        out_buf = 2 * P * OH * OW * 4               # double-buffered f32 output block
        work = P * Hp8 * Wp * cbytes                # casted copy of x
        work += P * Hp8 * OW * (4 + cbytes)         # y (f32 acc + casted)
        bands = (Wp * OW + OH * Hp8) * (4 + cbytes)
        return in_buf + out_buf + work + bands

    # Largest divisor of NC (capped at 16 to bound unrolling) whose block fits.
    P = 1
    for cand in range(min(NC, 16), 0, -1):
        if NC % cand == 0 and _block_bytes(cand) <= budget:
            P = cand
            break
    # TODO(synk): if even P=1 exceeds the budget (very large planes on v7x),
    # add an output-row grid axis with a (K-1)-row halo and tile Mh over OW.

    taps = tuple(float(v) for v in k1)              # compile-time tap constants
    kernel_fn = functools.partial(
        _downsample_block_kernel, taps=taps, factor=factor,
        compute_dtype=compute_dtype)

    out = pl.pallas_call(
        kernel_fn,
        out_shape=jax.ShapeDtypeStruct((NC, OH, OW), jnp.float32),
        grid=(NC // P,),
        in_specs=[pl.BlockSpec((P, Hp8, Wp), lambda n: (n, 0, 0))],
        out_specs=pl.BlockSpec((P, OH, OW), lambda n: (n, 0, 0)),
        compiler_params=pltpu.CompilerParams(
            dimension_semantics=("parallel",),
            vmem_limit_bytes=vmem_limit,
        ),
    )(x_r)

    # Conv2d bias is explicitly zeroed in Downsampler.__init__, so no bias add.
    return out.reshape(N, C, OH, OW)


# ----------------------------------------------------------------------------
# Pure-JAX reference (for correctness check only)
# ----------------------------------------------------------------------------
def _ref_downsampler(x_nchw, kernel2d, factor, preserve_size=False):
    C = x_nchw.shape[1]
    K = int(kernel2d.shape[0])
    x = x_nchw
    if preserve_size:
        pad = (K - 1) // 2 if K % 2 == 1 else (K - factor) // 2
        x = jnp.pad(x, ((0, 0), (0, 0), (pad, pad), (pad, pad)), mode='edge')
    w = jnp.broadcast_to(jnp.asarray(kernel2d, jnp.float32), (C, 1, K, K))
    return jax.lax.conv_general_dilated(
        x, w, window_strides=(factor, factor), padding='VALID',
        dimension_numbers=('NCHW', 'OIHW', 'NCHW'),
        feature_group_count=C,
        precision=jax.lax.Precision.HIGHEST)


if __name__ == "__main__":
    # Downsampler(n_planes=4, factor=2, kernel_type='lanczos2', phase=0)
    n_planes = 4
    factor = 2
    support = 2
    kernel_width = 4 * factor + 1                   # lanczos2 -> 9x9 kernel
    blur_kernel = get_kernel(factor, 'lanczos', 0, kernel_width, support=support)

    key = jax.random.PRNGKey(0)
    x = jax.random.normal(key, (2, n_planes, 16, 16), dtype=jnp.float32)

    ref = _ref_downsampler(x, blur_kernel, factor, preserve_size=False)
    ref_p = _ref_downsampler(x, blur_kernel, factor, preserve_size=True)

    # f32 MXU path: tight tolerance against the HIGHEST-precision conv reference.
    out32 = downsampler_forward(x, blur_kernel, factor,
                                preserve_size=False, use_bf16=False)
    out32 = jax.block_until_ready(out32)
    np.testing.assert_allclose(np.asarray(out32), np.asarray(ref),
                               rtol=1e-3, atol=1e-4)

    # bf16 MXU path (default, fast): tolerance sized for the ~2^-9 relative
    # rounding of bf16 inputs/weights; real indexing/weight bugs would be
    # orders of magnitude larger.
    RTOL_BF16, ATOL_BF16 = 2e-2, 1e-2

    out = downsampler_forward(x, blur_kernel, factor, preserve_size=False)
    out = jax.block_until_ready(out)
    np.testing.assert_allclose(np.asarray(out), np.asarray(ref),
                               rtol=RTOL_BF16, atol=ATOL_BF16)

    # preserve_size=True path (ReplicationPad2d) as well
    out_p = downsampler_forward(x, blur_kernel, factor, preserve_size=True)
    out_p = jax.block_until_ready(out_p)
    np.testing.assert_allclose(np.asarray(out_p), np.asarray(ref_p),
                               rtol=RTOL_BF16, atol=ATOL_BF16)

    print("KERNEL_OK")
</pallas_src>

<mosaic_0001>
module attributes {stable_mosaic.version = 11 : i64} {
  func.func @_downsample_block_kernel(%arg0: i32, %arg1: memref<8x16x16xf32, #tpu.memory_space<vmem>>, %arg2: memref<8x4x4xf32, #tpu.memory_space<vmem>>) attributes {dimension_semantics = [#tpu.dimension_semantics<parallel>], iteration_bounds = array<i64: 1>, scalar_prefetch = 0 : i64, scratch_operands = 0 : i64, tpu.core_type = #tpu.core_type<tc>, window_params = [{transform_indices = @transform_0, window_bounds = array<i64: 8, 16, 16>}, {transform_indices = @transform_1, window_bounds = array<i64: 8, 4, 4>}]} {
    %0 = tpu.iota {dimensions = array<i32: 0>} : vector<16x4xi32>
    %1 = tpu.iota {dimensions = array<i32: 1>} : vector<16x4xi32>
    %c2_i32 = arith.constant 2 : i32
    %2 = vector.broadcast %c2_i32 : i32 to vector<16x4xi32>
    %3 = arith.muli %1, %2 : vector<16x4xi32>
    %4 = arith.subi %0, %3 : vector<16x4xi32>
    %cst = arith.constant 0.000000e+00 : f32
    %5 = vector.broadcast %cst : f32 to vector<16x4xf32>
    %c0_i32 = arith.constant 0 : i32
    %6 = vector.broadcast %c0_i32 : i32 to vector<16x4xi32>
    %7 = arith.cmpi eq, %4, %6 : vector<16x4xi32>
    %cst_0 = arith.constant -7.526559E-34 : f32
    %8 = vector.broadcast %cst_0 : f32 to vector<16x4xf32>
    %9 = arith.select %7, %8, %5 : vector<16x4xi1>, vector<16x4xf32>
    %c1_i32 = arith.constant 1 : i32
    %10 = vector.broadcast %c1_i32 : i32 to vector<16x4xi32>
    %11 = arith.cmpi eq, %4, %10 : vector<16x4xi32>
    %cst_1 = arith.constant -0.0315433107 : f32
    %12 = vector.broadcast %cst_1 : f32 to vector<16x4xf32>
    %13 = arith.select %11, %12, %9 : vector<16x4xi1>, vector<16x4xf32>
    %c2_i32_2 = arith.constant 2 : i32
    %14 = vector.broadcast %c2_i32_2 : i32 to vector<16x4xi32>
    %15 = arith.cmpi eq, %4, %14 : vector<16x4xi32>
    %cst_3 = arith.constant 1.22918038E-17 : f32
    %16 = vector.broadcast %cst_3 : f32 to vector<16x4xf32>
    %17 = arith.select %15, %16, %13 : vector<16x4xi1>, vector<16x4xf32>
    %c3_i32 = arith.constant 3 : i32
    %18 = vector.broadcast %c3_i32 : i32 to vector<16x4xi32>
    %19 = arith.cmpi eq, %4, %18 : vector<16x4xi32>
    %cst_4 = arith.constant 0.283889771 : f32
    %20 = vector.broadcast %cst_4 : f32 to vector<16x4xf32>
    %21 = arith.select %19, %20, %17 : vector<16x4xi1>, vector<16x4xf32>
    %c4_i32 = arith.constant 4 : i32
    %22 = vector.broadcast %c4_i32 : i32 to vector<16x4xi32>
    %23 = arith.cmpi eq, %4, %22 : vector<16x4xi32>
    %cst_5 = arith.constant 0.495307058 : f32
    %24 = vector.broadcast %cst_5 : f32 to vector<16x4xf32>
    %25 = arith.select %23, %24, %21 : vector<16x4xi1>, vector<16x4xf32>
    %c5_i32 = arith.constant 5 : i32
    %26 = vector.broadcast %c5_i32 : i32 to vector<16x4xi32>
    %27 = arith.cmpi eq, %4, %26 : vector<16x4xi32>
    %cst_6 = arith.constant 0.283889771 : f32
    %28 = vector.broadcast %cst_6 : f32 to vector<16x4xf32>
    %29 = arith.select %27, %28, %25 : vector<16x4xi1>, vector<16x4xf32>
    %c6_i32 = arith.constant 6 : i32
    %30 = vector.broadcast %c6_i32 : i32 to vector<16x4xi32>
    %31 = arith.cmpi eq, %4, %30 : vector<16x4xi32>
    %cst_7 = arith.constant 1.22918038E-17 : f32
    %32 = vector.broadcast %cst_7 : f32 to vector<16x4xf32>
    %33 = arith.select %31, %32, %29 : vector<16x4xi1>, vector<16x4xf32>
    %c7_i32 = arith.constant 7 : i32
    %34 = vector.broadcast %c7_i32 : i32 to vector<16x4xi32>
    %35 = arith.cmpi eq, %4, %34 : vector<16x4xi32>
    %cst_8 = arith.constant -0.0315433107 : f32
    %36 = vector.broadcast %cst_8 : f32 to vector<16x4xf32>
    %37 = arith.select %35, %36, %33 : vector<16x4xi1>, vector<16x4xf32>
    %c8_i32 = arith.constant 8 : i32
    %38 = vector.broadcast %c8_i32 : i32 to vector<16x4xi32>
    %39 = arith.cmpi eq, %4, %38 : vector<16x4xi32>
    %cst_9 = arith.constant -7.526559E-34 : f32
    %40 = vector.broadcast %cst_9 : f32 to vector<16x4xf32>
    %41 = arith.select %39, %40, %37 : vector<16x4xi1>, vector<16x4xf32>
    %42 = tpu.iota {dimensions = array<i32: 1>} : vector<4x16xi32>
    %43 = tpu.iota {dimensions = array<i32: 0>} : vector<4x16xi32>
    %c2_i32_10 = arith.constant 2 : i32
    %44 = vector.broadcast %c2_i32_10 : i32 to vector<4x16xi32>
    %45 = arith.muli %43, %44 : vector<4x16xi32>
    %46 = arith.subi %42, %45 : vector<4x16xi32>
    %cst_11 = arith.constant 0.000000e+00 : f32
    %47 = vector.broadcast %cst_11 : f32 to vector<4x16xf32>
    %c0_i32_12 = arith.constant 0 : i32
    %48 = vector.broadcast %c0_i32_12 : i32 to vector<4x16xi32>
    %49 = arith.cmpi eq, %46, %48 : vector<4x16xi32>
    %cst_13 = arith.constant -7.526559E-34 : f32
    %50 = vector.broadcast %cst_13 : f32 to vector<4x16xf32>
    %51 = arith.select %49, %50, %47 : vector<4x16xi1>, vector<4x16xf32>
    %c1_i32_14 = arith.constant 1 : i32
    %52 = vector.broadcast %c1_i32_14 : i32 to vector<4x16xi32>
    %53 = arith.cmpi eq, %46, %52 : vector<4x16xi32>
    %cst_15 = arith.constant -0.0315433107 : f32
    %54 = vector.broadcast %cst_15 : f32 to vector<4x16xf32>
    %55 = arith.select %53, %54, %51 : vector<4x16xi1>, vector<4x16xf32>
    %c2_i32_16 = arith.constant 2 : i32
    %56 = vector.broadcast %c2_i32_16 : i32 to vector<4x16xi32>
    %57 = arith.cmpi eq, %46, %56 : vector<4x16xi32>
    %cst_17 = arith.constant 1.22918038E-17 : f32
    %58 = vector.broadcast %cst_17 : f32 to vector<4x16xf32>
    %59 = arith.select %57, %58, %55 : vector<4x16xi1>, vector<4x16xf32>
    %c3_i32_18 = arith.constant 3 : i32
    %60 = vector.broadcast %c3_i32_18 : i32 to vector<4x16xi32>
    %61 = arith.cmpi eq, %46, %60 : vector<4x16xi32>
    %cst_19 = arith.constant 0.283889771 : f32
    %62 = vector.broadcast %cst_19 : f32 to vector<4x16xf32>
    %63 = arith.select %61, %62, %59 : vector<4x16xi1>, vector<4x16xf32>
    %c4_i32_20 = arith.constant 4 : i32
    %64 = vector.broadcast %c4_i32_20 : i32 to vector<4x16xi32>
    %65 = arith.cmpi eq, %46, %64 : vector<4x16xi32>
    %cst_21 = arith.constant 0.495307058 : f32
    %66 = vector.broadcast %cst_21 : f32 to vector<4x16xf32>
    %67 = arith.select %65, %66, %63 : vector<4x16xi1>, vector<4x16xf32>
    %c5_i32_22 = arith.constant 5 : i32
    %68 = vector.broadcast %c5_i32_22 : i32 to vector<4x16xi32>
    %69 = arith.cmpi eq, %46, %68 : vector<4x16xi32>
    %cst_23 = arith.constant 0.283889771 : f32
    %70 = vector.broadcast %cst_23 : f32 to vector<4x16xf32>
    %71 = arith.select %69, %70, %67 : vector<4x16xi1>, vector<4x16xf32>
    %c6_i32_24 = arith.constant 6 : i32
    %72 = vector.broadcast %c6_i32_24 : i32 to vector<4x16xi32>
    %73 = arith.cmpi eq, %46, %72 : vector<4x16xi32>
    %cst_25 = arith.constant 1.22918038E-17 : f32
    %74 = vector.broadcast %cst_25 : f32 to vector<4x16xf32>
    %75 = arith.select %73, %74, %71 : vector<4x16xi1>, vector<4x16xf32>
    %c7_i32_26 = arith.constant 7 : i32
    %76 = vector.broadcast %c7_i32_26 : i32 to vector<4x16xi32>
    %77 = arith.cmpi eq, %46, %76 : vector<4x16xi32>
    %cst_27 = arith.constant -0.0315433107 : f32
    %78 = vector.broadcast %cst_27 : f32 to vector<4x16xf32>
    %79 = arith.select %77, %78, %75 : vector<4x16xi1>, vector<4x16xf32>
    %c8_i32_28 = arith.constant 8 : i32
    %80 = vector.broadcast %c8_i32_28 : i32 to vector<4x16xi32>
    %81 = arith.cmpi eq, %46, %80 : vector<4x16xi32>
    %cst_29 = arith.constant -7.526559E-34 : f32
    %82 = vector.broadcast %cst_29 : f32 to vector<4x16xf32>
    %83 = arith.select %81, %82, %79 : vector<4x16xi1>, vector<4x16xf32>
    %c0 = arith.constant 0 : index
    %c0_30 = arith.constant 0 : index
    %c0_31 = arith.constant 0 : index
    %84 = vector.load %arg1[%c0, %c0_30, %c0_31] : memref<8x16x16xf32, #tpu.memory_space<vmem>>, vector<8x16x16xf32>
    %85 = vector.shape_cast %84 : vector<8x16x16xf32> to vector<128x16xf32>
    %cst_32 = arith.constant dense<0.000000e+00> : vector<128x4xf32>
    %86 = tpu.matmul %85, %41, %cst_32 {dimension_numbers = #tpu.dot_dimension_numbers<[1], [0], [0], [1], [0, 0, 1, 1], [], []>} : vector<128x16xf32>, vector<16x4xf32>, vector<128x4xf32> -> vector<128x4xf32>
    %87 = vector.shape_cast %86 : vector<128x4xf32> to vector<8x16x4xf32>
    %88 = vector.extract_strided_slice %87 {offsets = [0, 0, 0], sizes = [1, 16, 4], strides = [1, 1, 1]} : vector<8x16x4xf32> to vector<1x16x4xf32>
    %89 = vector.shape_cast %88 : vector<1x16x4xf32> to vector<16x4xf32>
    %cst_33 = arith.constant dense<0.000000e+00> : vector<4x4xf32>
    %90 = tpu.matmul %83, %89, %cst_33 {dimension_numbers = #tpu.dot_dimension_numbers<[1], [0], [0], [1], [0, 0, 1, 1], [], []>} : vector<4x16xf32>, vector<16x4xf32>, vector<4x4xf32> -> vector<4x4xf32>
    %c0_34 = arith.constant 0 : index
    %c0_35 = arith.constant 0 : index
    %c0_36 = arith.constant 0 : index
    %91 = vector.load %arg2[%c0_34, %c0_35, %c0_36] : memref<8x4x4xf32, #tpu.memory_space<vmem>>, vector<1x4x4xf32>
    %92 = vector.shape_cast %91 : vector<1x4x4xf32> to vector<4x4xf32>
    %93 = vector.shape_cast %90 : vector<4x4xf32> to vector<1x4x4xf32>
    tpu.vector_store %arg2[%c0_34, %c0_35, %c0_36], %93 {strides = array<i32>} : memref<8x4x4xf32, #tpu.memory_space<vmem>>, vector<1x4x4xf32>,
    %94 = vector.extract_strided_slice %87 {offsets = [1, 0, 0], sizes = [1, 16, 4], strides = [1, 1, 1]} : vector<8x16x4xf32> to vector<1x16x4xf32>
    %95 = vector.shape_cast %94 : vector<1x16x4xf32> to vector<16x4xf32>
    %cst_37 = arith.constant dense<0.000000e+00> : vector<4x4xf32>
    %96 = tpu.matmul %83, %95, %cst_37 {dimension_numbers = #tpu.dot_dimension_numbers<[1], [0], [0], [1], [0, 0, 1, 1], [], []>} : vector<4x16xf32>, vector<16x4xf32>, vector<4x4xf32> -> vector<4x4xf32>
    %c1 = arith.constant 1 : index
    %c0_38 = arith.constant 0 : index
    %c0_39 = arith.constant 0 : index
    %97 = vector.load %arg2[%c1, %c0_38, %c0_39] : memref<8x4x4xf32, #tpu.memory_space<vmem>>, vector<1x4x4xf32>
    %98 = vector.shape_cast %97 : vector<1x4x4xf32> to vector<4x4xf32>
    %99 = vector.shape_cast %96 : vector<4x4xf32> to vector<1x4x4xf32>
    tpu.vector_store %arg2[%c1, %c0_38, %c0_39], %99 {strides = array<i32>} : memref<8x4x4xf32, #tpu.memory_space<vmem>>, vector<1x4x4xf32>,
    %100 = vector.extract_strided_slice %87 {offsets = [2, 0, 0], sizes = [1, 16, 4], strides = [1, 1, 1]} : vector<8x16x4xf32> to vector<1x16x4xf32>
    %101 = vector.shape_cast %100 : vector<1x16x4xf32> to vector<16x4xf32>
    %cst_40 = arith.constant dense<0.000000e+00> : vector<4x4xf32>
    %102 = tpu.matmul %83, %101, %cst_40 {dimension_numbers = #tpu.dot_dimension_numbers<[1], [0], [0], [1], [0, 0, 1, 1], [], []>} : vector<4x16xf32>, vector<16x4xf32>, vector<4x4xf32> -> vector<4x4xf32>
    %c2 = arith.constant 2 : index
    %c0_41 = arith.constant 0 : index
    %c0_42 = arith.constant 0 : index
    %103 = vector.load %arg2[%c2, %c0_41, %c0_42] : memref<8x4x4xf32, #tpu.memory_space<vmem>>, vector<1x4x4xf32>
    %104 = vector.shape_cast %103 : vector<1x4x4xf32> to vector<4x4xf32>
    %105 = vector.shape_cast %102 : vector<4x4xf32> to vector<1x4x4xf32>
    tpu.vector_store %arg2[%c2, %c0_41, %c0_42], %105 {strides = array<i32>} : memref<8x4x4xf32, #tpu.memory_space<vmem>>, vector<1x4x4xf32>,
    %106 = vector.extract_strided_slice %87 {offsets = [3, 0, 0], sizes = [1, 16, 4], strides = [1, 1, 1]} : vector<8x16x4xf32> to vector<1x16x4xf32>
    %107 = vector.shape_cast %106 : vector<1x16x4xf32> to vector<16x4xf32>
    %cst_43 = arith.constant dense<0.000000e+00> : vector<4x4xf32>
    %108 = tpu.matmul %83, %107, %cst_43 {dimension_numbers = #tpu.dot_dimension_numbers<[1], [0], [0], [1], [0, 0, 1, 1], [], []>} : vector<4x16xf32>, vector<16x4xf32>, vector<4x4xf32> -> vector<4x4xf32>
    %c3 = arith.constant 3 : index
    %c0_44 = arith.constant 0 : index
    %c0_45 = arith.constant 0 : index
    %109 = vector.load %arg2[%c3, %c0_44, %c0_45] : memref<8x4x4xf32, #tpu.memory_space<vmem>>, vector<1x4x4xf32>
    %110 = vector.shape_cast %109 : vector<1x4x4xf32> to vector<4x4xf32>
    %111 = vector.shape_cast %108 : vector<4x4xf32> to vector<1x4x4xf32>
    tpu.vector_store %arg2[%c3, %c0_44, %c0_45], %111 {strides = array<i32>} : memref<8x4x4xf32, #tpu.memory_space<vmem>>, vector<1x4x4xf32>,
    %112 = vector.extract_strided_slice %87 {offsets = [4, 0, 0], sizes = [1, 16, 4], strides = [1, 1, 1]} : vector<8x16x4xf32> to vector<1x16x4xf32>
    %113 = vector.shape_cast %112 : vector<1x16x4xf32> to vector<16x4xf32>
    %cst_46 = arith.constant dense<0.000000e+00> : vector<4x4xf32>
    %114 = tpu.matmul %83, %113, %cst_46 {dimension_numbers = #tpu.dot_dimension_numbers<[1], [0], [0], [1], [0, 0, 1, 1], [], []>} : vector<4x16xf32>, vector<16x4xf32>, vector<4x4xf32> -> vector<4x4xf32>
    %c4 = arith.constant 4 : index
    %c0_47 = arith.constant 0 : index
    %c0_48 = arith.constant 0 : index
    %115 = vector.load %arg2[%c4, %c0_47, %c0_48] : memref<8x4x4xf32, #tpu.memory_space<vmem>>, vector<1x4x4xf32>
    %116 = vector.shape_cast %115 : vector<1x4x4xf32> to vector<4x4xf32>
    %117 = vector.shape_cast %114 : vector<4x4xf32> to vector<1x4x4xf32>
    tpu.vector_store %arg2[%c4, %c0_47, %c0_48], %117 {strides = array<i32>} : memref<8x4x4xf32, #tpu.memory_space<vmem>>, vector<1x4x4xf32>,
    %118 = vector.extract_strided_slice %87 {offsets = [5, 0, 0], sizes = [1, 16, 4], strides = [1, 1, 1]} : vector<8x16x4xf32> to vector<1x16x4xf32>
    %119 = vector.shape_cast %118 : vector<1x16x4xf32> to vector<16x4xf32>
    %cst_49 = arith.constant dense<0.000000e+00> : vector<4x4xf32>
    %120 = tpu.matmul %83, %119, %cst_49 {dimension_numbers = #tpu.dot_dimension_numbers<[1], [0], [0], [1], [0, 0, 1, 1], [], []>} : vector<4x16xf32>, vector<16x4xf32>, vector<4x4xf32> -> vector<4x4xf32>
    %c5 = arith.constant 5 : index
    %c0_50 = arith.constant 0 : index
    %c0_51 = arith.constant 0 : index
    %121 = vector.load %arg2[%c5, %c0_50, %c0_51] : memref<8x4x4xf32, #tpu.memory_space<vmem>>, vector<1x4x4xf32>
    %122 = vector.shape_cast %121 : vector<1x4x4xf32> to vector<4x4xf32>
    %123 = vector.shape_cast %120 : vector<4x4xf32> to vector<1x4x4xf32>
    tpu.vector_store %arg2[%c5, %c0_50, %c0_51], %123 {strides = array<i32>} : memref<8x4x4xf32, #tpu.memory_space<vmem>>, vector<1x4x4xf32>,
    %124 = vector.extract_strided_slice %87 {offsets = [6, 0, 0], sizes = [1, 16, 4], strides = [1, 1, 1]} : vector<8x16x4xf32> to vector<1x16x4xf32>
    %125 = vector.shape_cast %124 : vector<1x16x4xf32> to vector<16x4xf32>
    %cst_52 = arith.constant dense<0.000000e+00> : vector<4x4xf32>
    %126 = tpu.matmul %83, %125, %cst_52 {dimension_numbers = #tpu.dot_dimension_numbers<[1], [0], [0], [1], [0, 0, 1, 1], [], []>} : vector<4x16xf32>, vector<16x4xf32>, vector<4x4xf32> -> vector<4x4xf32>
    %c6 = arith.constant 6 : index
    %c0_53 = arith.constant 0 : index
    %c0_54 = arith.constant 0 : index
    %127 = vector.load %arg2[%c6, %c0_53, %c0_54] : memref<8x4x4xf32, #tpu.memory_space<vmem>>, vector<1x4x4xf32>
    %128 = vector.shape_cast %127 : vector<1x4x4xf32> to vector<4x4xf32>
    %129 = vector.shape_cast %126 : vector<4x4xf32> to vector<1x4x4xf32>
    tpu.vector_store %arg2[%c6, %c0_53, %c0_54], %129 {strides = array<i32>} : memref<8x4x4xf32, #tpu.memory_space<vmem>>, vector<1x4x4xf32>,
    %130 = vector.extract_strided_slice %87 {offsets = [7, 0, 0], sizes = [1, 16, 4], strides = [1, 1, 1]} : vector<8x16x4xf32> to vector<1x16x4xf32>
    %131 = vector.shape_cast %130 : vector<1x16x4xf32> to vector<16x4xf32>
    %cst_55 = arith.constant dense<0.000000e+00> : vector<4x4xf32>
    %132 = tpu.matmul %83, %131, %cst_55 {dimension_numbers = #tpu.dot_dimension_numbers<[1], [0], [0], [1], [0, 0, 1, 1], [], []>} : vector<4x16xf32>, vector<16x4xf32>, vector<4x4xf32> -> vector<4x4xf32>
    %c7 = arith.constant 7 : index
    %c0_56 = arith.constant 0 : index
    %c0_57 = arith.constant 0 : index
    %133 = vector.load %arg2[%c7, %c0_56, %c0_57] : memref<8x4x4xf32, #tpu.memory_space<vmem>>, vector<1x4x4xf32>
    %134 = vector.shape_cast %133 : vector<1x4x4xf32> to vector<4x4xf32>
    %135 = vector.shape_cast %132 : vector<4x4xf32> to vector<1x4x4xf32>
    tpu.vector_store %arg2[%c7, %c0_56, %c0_57], %135 {strides = array<i32>} : memref<8x4x4xf32, #tpu.memory_space<vmem>>, vector<1x4x4xf32>,
    return
  }
  func.func @transform_0(%arg0: i32) -> (i32, i32, i32) {
    %c0_i32 = arith.constant 0 : i32
    %c0_i32_0 = arith.constant 0 : i32
    %c0_i32_1 = arith.constant 0 : i32
    return %arg0, %c0_i32, %c0_i32_0 : i32, i32, i32
  }
  func.func @transform_1(%arg0: i32) -> (i32, i32, i32) {
    %c0_i32 = arith.constant 0 : i32
    %c0_i32_0 = arith.constant 0 : i32
    %c0_i32_1 = arith.constant 0 : i32
    return %arg0, %c0_i32, %c0_i32_0 : i32, i32, i32
  }
}

</mosaic_0001>

<bundles_post_ra>
// kernel: tpu_custom_call.1
= control target key start
LH: loop header
LB: loop body
LE: loop exit
PB: predicated region body
PF: predicated region fallthrough
CT: control target
= control target key end

     0   :  { %6 = vsyncpa [#allocation3], 0  ;;  %s1095_s6 = smov [#allocation2]   ;;  %s1217_s0 = inlined_call_operand.hbm [shape: f32[8,16,16], index: 0, kind: input, shape index: {}]   ;;  %s1218_s1 = inlined_call_operand.vmem [shape: f32[8,4,4], index: 1, kind: output, shape index: {}]  }
   0x1   :  { %s12_s7 = sshll.u32 %s1095_s6, 4  ;;  %s1071_s10 = scalar_lea.hbm %s1217_s0, 2048  ;;  %s13_s7 = int_to_ptr.vmem [resolvable:$true] %s12_s7 }
   0x2   :  { %p1072_p0 = scmp.ne.s32.totalorder %s1217_s0, %s1071_s10  ;;  %p1075_p1 = scmp.lt.u32.totalorder %s1071_s10, %s1217_s0 }
   0x4   :  { %p1077_p2 = pnand %p1075_p1, %p1072_p0 }
   0x6   :  { %1080 = shalt.err (!%p1077_p2)
}
   0x7   :  { %s1081_s15 = scalar_lea.vmem %s13_s7, 2048  ;;  %p1086_p4 = scmp.lt.s32.totalorder %s13_s7, %s13_s7 }
   0x8   :  { %p1082_p3 = scmp.ne.s32.totalorder %s13_s7, %s1081_s15  ;;  %p1087_p5 = scmp.lt.s32.totalorder %s1081_s15, %s1081_s15 }
   0xa   :  { %p1088_p6 = por %p1087_p5, %p1086_p4 }
   0xc   :  { %p1089_p7 = pnand %p1088_p6, %p1082_p3 }
   0xe   :  { %1092 = shalt.err (!%p1089_p7)
}
   0xf   :  { %s1096_s16 = smov 128   ;;  %s1097_s17 = smov 8  }
  0x10   :  { %18 = dma.hbm_to_vmem [thread:$0]  %s1217_s0, 2048, %s13_s7, [#allocation3], %s1096_s16, %s1096_s16, %s1097_s17  }
  0x11   :  { %1093 = dma.done.wait [#allocation3], 2048  }
  0x12   :  { %1094 = vsyncadd [#allocation3], 4294965248  ;;  %v22_v0 = vlaneseq  ;;  %vm102_vm0 = vcmask 130048   ;;  %v86_v9 = vld [vmem:[#allocation2] sm:$0xff]  ;;  %v1098_v10 = vmov 0.0   ;;  %v87_v30 = vld [vmem:[#allocation2 + $0x8] sm:$0xff] }
  0x13   :  { %957 = vmatprep.mubr.msk.f32.mxu0 %vm102_vm0, %v86_v9  ;;  %v88_v31 = vld [vmem:[#allocation2 + $0x10] sm:$0xff]  ;;  %v89_v32 = vld [vmem:[#allocation2 + $0x18] sm:$0xff]  ;;  %v90_v33 = vld [vmem:[#allocation2 + $0x20] sm:$0xff]  ;;  %v1099_v45 = vmov 0.0|0.0  }
  0x14   :  { %v23_v1 = vshrl.u32 %v22_v0, 7  ;;  %v26_v2 = vand.u32 127, %v22_v0  ;;  %v91_v34 = vld [vmem:[#allocation2 + $0x28] sm:$0xff]  ;;  %v92_v35 = vld [vmem:[#allocation2 + $0x30] sm:$0xff]  ;;  %v93_v36 = vld [vmem:[#allocation2 + $0x38] sm:$0xff]  ;;  %1041 = vmatprep.subr.bf16.mxu1 %v1099_v45 }
  0x15   :  { %v94_v37 = vld [vmem:[#allocation2 + $0x40] sm:$0xff]  ;;  %v95_v38 = vld [vmem:[#allocation2 + $0x48] sm:$0xff]  ;;  %v96_v39 = vld [vmem:[#allocation2 + $0x50] sm:$0xff] }
  0x16   :  { %v24_v3 = vadd.s32 8, %v23_v1  ;;  %v27_v4 = vmul.u32 2, %v26_v2  ;;  %v66_v5 = vmul.u32 2, %v23_v1  ;;  %v97_v40 = vld [vmem:[#allocation2 + $0x58] sm:$0xff]  ;;  %v98_v41 = vld [vmem:[#allocation2 + $0x60] sm:$0xff]  ;;  %v99_v42 = vld [vmem:[#allocation2 + $0x68] sm:$0xff] }
  0x17   :  { %v100_v43 = vld [vmem:[#allocation2 + $0x70] sm:$0xff]  ;;  %v101_v44 = vld [vmem:[#allocation2 + $0x78] sm:$0xff] }
  0x18   :  { %v28_v6 = vsub.s32 %v23_v1, %v27_v4  ;;  %v29_v7 = vsub.s32 %v24_v3, %v27_v4  ;;  %v1123_v8 = vsub.s32 %v26_v2, %v66_v5 }
  0x1a   :  { %vm30_vm1 = vcmp.eq.s32.totalorder %v28_v6, 0  ;;  %vm31_vm2 = vcmp.eq.s32.totalorder %v29_v7, 0  ;;  %vm34_vm3 = vcmp.eq.s32.totalorder %v28_v6, 1  ;;  %vm35_vm4 = vcmp.eq.s32.totalorder %v29_v7, 1 }
  0x1b   :  { %v32_v11 = vsel %vm30_vm1, -7.526559e-34, %v1098_v10  ;;  %v33_v12 = vsel %vm31_vm2, -7.526559e-34, %v1098_v10  ;;  %vm38_vm5 = vcmp.eq.s32.totalorder %v28_v6, 2  ;;  %vm39_vm6 = vcmp.eq.s32.totalorder %v29_v7, 2 }
  0x1c   :  { %v36_v13 = vsel %vm34_vm3, -0.03154331, %v32_v11  ;;  %v37_v14 = vsel %vm35_vm4, -0.03154331, %v33_v12  ;;  %vm42_vm7 = vcmp.eq.s32.totalorder %v28_v6, 3  ;;  %vm43_vm8 = vcmp.eq.s32.totalorder %v29_v7, 3 }
  0x1d   :  { %v40_v15 = vsel %vm38_vm5, 1.2291804e-17, %v36_v13  ;;  %v41_v16 = vsel %vm39_vm6, 1.2291804e-17, %v37_v14  ;;  %vm46_vm9 = vcmp.eq.s32.totalorder %v28_v6, 4  ;;  %vm47_vm10 = vcmp.eq.s32.totalorder %v29_v7, 4 }
  0x1e   :  { %v44_v17 = vsel %vm42_vm7, 0.28388977, %v40_v15  ;;  %v45_v18 = vsel %vm43_vm8, 0.28388977, %v41_v16  ;;  %vm50_vm11 = vcmp.eq.s32.totalorder %v28_v6, 5  ;;  %vm51_vm12 = vcmp.eq.s32.totalorder %v29_v7, 5 }
  0x1f   :  { %v48_v19 = vsel %vm46_vm9, 0.49530706, %v44_v17  ;;  %v49_v20 = vsel %vm47_vm10, 0.49530706, %v45_v18  ;;  %vm54_vm13 = vcmp.eq.s32.totalorder %v28_v6, 6  ;;  %vm55_vm14 = vcmp.eq.s32.totalorder %v29_v7, 6 }
  0x20   :  { %v52_v21 = vsel %vm50_vm11, 0.28388977, %v48_v19  ;;  %v53_v22 = vsel %vm51_vm12, 0.28388977, %v49_v20  ;;  %vm58_vm15 = vcmp.eq.s32.totalorder %v28_v6, 7  ;;  %vm59_vm1 = vcmp.eq.s32.totalorder %v29_v7, 7 }
  0x21   :  { %v56_v23 = vsel %vm54_vm13, 1.2291804e-17, %v52_v21  ;;  %v57_v24 = vsel %vm55_vm14, 1.2291804e-17, %v53_v22  ;;  %vm62_vm2 = vcmp.eq.s32.totalorder %v28_v6, 8  ;;  %vm63_vm3 = vcmp.eq.s32.totalorder %v29_v7, 8 }
  0x22   :  { %v60_v25 = vsel %vm58_vm15, -0.03154331, %v56_v23  ;;  %v61_v26 = vsel %vm59_vm1, -0.03154331, %v57_v24  ;;  %vm1100_vm4 = vmmov 0   ;;  %vm68_vm5 = vcmp.eq.s32.totalorder %v1123_v8, 0 }
  0x23   :  { %v64_v27 = vsel %vm62_vm2, -7.526559e-34, %v60_v25  ;;  %v65_v28 = vsel %vm63_vm3, -7.526559e-34, %v61_v26  ;;  %985 = vmatprep.mubr.msk.f32.mxu1 %vm1100_vm4, %v1098_v10  ;;  %v69_v46 = vsel %vm68_vm5, -7.526559e-34, %v1098_v10 }
  0x24   :  { %v1037_v29 = vpack.c.bf16 %v65_v28, %v64_v27  ;;  %vm70_vm6 = vcmp.eq.s32.totalorder %v1123_v8, 1  ;;  %vm72_vm7 = vcmp.eq.s32.totalorder %v1123_v8, 2  ;;  %vm74_vm8 = vcmp.eq.s32.totalorder %v1123_v8, 3 }
  0x25   :  { %v71_v47 = vsel %vm70_vm6, -0.03154331, %v69_v46  ;;  %vm76_vm9 = vcmp.eq.s32.totalorder %v1123_v8, 4  ;;  %vm78_vm10 = vcmp.eq.s32.totalorder %v1123_v8, 5  ;;  %vm80_vm11 = vcmp.eq.s32.totalorder %v1123_v8, 6 }
  0x26   :  { %1038 = vmatprep.subr.bf16.mxu0 %v1037_v29  ;;  %v73_v48 = vsel %vm72_vm7, 1.2291804e-17, %v71_v47  ;;  %vm82_vm12 = vcmp.eq.s32.totalorder %v1123_v8, 7  ;;  %vm84_vm13 = vcmp.eq.s32.totalorder %v1123_v8, 8  ;;  %vm369_vm14 = vcmask 27648  }
  0x27   :  { %1040 = vmatpush3.bf16.msra.mxu0 %v1037_v29  ;;  %v75_v49 = vsel %vm74_vm8, 0.28388977, %v73_v48 }
  0x28   :  { %v77_v50 = vsel %vm76_vm9, 0.49530706, %v75_v49 }
  0x29   :  { %v79_v51 = vsel %vm78_vm10, 0.28388977, %v77_v50 }
  0x2a   :  { %958 = vmatmul.mubr.msk.f32.vlgmr.msra.gmra.mrb[0].mxu0 %vm102_vm0, %v87_v30  ;;  %v81_v52 = vsel %vm80_vm11, 1.2291804e-17, %v79_v51 }
  0x2b   :  { %960 = vmatprep.mubr.msk.f32.mxu0 %vm102_vm0, %v88_v31  ;;  %v83_v55 = vsel %vm82_vm12, -0.03154331, %v81_v52 }
  0x2c   :  { %v85_v58 = vsel %vm84_vm13, -7.526559e-34, %v83_v55 }
  0x2e   :  { %961 = vmatmul.mubr.msk.f32.gmra.mrb[2].mxu0 %vm102_vm0, %v89_v32 }
  0x2f   :  { %963 = vmatprep.mubr.msk.f32.mxu0 %vm102_vm0, %v90_v33 }
  0x32   :  { %964 = vmatmul.mubr.msk.f32.gmra.mrb[4].mxu0 %vm102_vm0, %v91_v34 }
  0x33   :  { %966 = vmatprep.mubr.msk.f32.mxu0 %vm102_vm0, %v92_v35 }
  0x36   :  { %967 = vmatmul.mubr.msk.f32.gmra.mrb[6].mxu0 %vm102_vm0, %v93_v36 }
  0x37   :  { %969 = vmatprep.mubr.msk.f32.mxu0 %vm102_vm0, %v94_v37 }
  0x3a   :  { %970 = vmatmul.mubr.msk.f32.gmra.mrb[8].mxu0 %vm102_vm0, %v95_v38 }
  0x3b   :  { %972 = vmatprep.mubr.msk.f32.mxu0 %vm102_vm0, %v96_v39 }
  0x3e   :  { %973 = vmatmul.mubr.msk.f32.gmra.mrb[10].mxu0 %vm102_vm0, %v97_v40 }
  0x3f   :  { %975 = vmatprep.mubr.msk.f32.mxu0 %vm102_vm0, %v98_v41 }
  0x42   :  { %976 = vmatmul.mubr.msk.f32.gmra.mrb[12].mxu0 %vm102_vm0, %v99_v42 }
  0x43   :  { %978 = vmatprep.mubr.msk.f32.mxu0 %vm102_vm0, %v100_v43 }
  0x46   :  { %979 = vmatmul.mubr.msk.f32.gmra.mrb[14].mxu0 %vm102_vm0, %v101_v44 }
  0xfd   :  { %v959_v53 = vpop.f32.mrb[0].mxu0 }
  0xfe   :  { %v217_v54 = vpop.f32.mrb[1].mxu0 }
  0xff   :  { %v1042_v56 = vpack.c.bf16 %v959_v53, %v217_v54 }
 0x101   :  { %v962_v57 = vpop.f32.mrb[2].mxu0  ;;  %1043 = vmatpush3.bf16.msra.mxu1 %v1042_v56 }
 0x102   :  { %v227_v59 = vpop.f32.mrb[3].mxu0  ;;  %1044 = vmatprep.subr.bf16.mxu1 %v1099_v45 }
 0x103   :  { %v1045_v60 = vpack.c.bf16 %v962_v57, %v227_v59 }
 0x104   :  { %986 = vmatmul.mubr.msk.f32.vlgmr.msra.gmra.mrb[0].mxu1 %vm102_vm0, %v85_v58 }
 0x105   :  { %v965_v61 = vpop.f32.mrb[4].mxu0  ;;  %1046 = vmatpush3.bf16.msra.mxu1 %v1045_v60  ;;  %992 = vmatprep.mubr.msk.f32.mxu1 %vm1100_vm4, %v1098_v10 }
 0x106   :  { %v237_v62 = vpop.f32.mrb[5].mxu0  ;;  %1047 = vmatprep.subr.bf16.mxu1 %v1099_v45 }
 0x107   :  { %v1048_v63 = vpack.c.bf16 %v965_v61, %v237_v62 }
 0x108   :  { %993 = vmatmul.mubr.msk.f32.vlgmr.msra.gmra.mrb[2].mxu1 %vm102_vm0, %v85_v58 }
 0x109   :  { %v968_v0 = vpop.f32.mrb[6].mxu0  ;;  %1049 = vmatpush3.bf16.msra.mxu1 %v1048_v63  ;;  %999 = vmatprep.mubr.msk.f32.mxu1 %vm1100_vm4, %v1098_v10 }
 0x10a   :  { %v247_v1 = vpop.f32.mrb[7].mxu0  ;;  %1050 = vmatprep.subr.bf16.mxu1 %v1099_v45 }
 0x10b   :  { %v1051_v2 = vpack.c.bf16 %v968_v0, %v247_v1 }
 0x10c   :  { %1000 = vmatmul.mubr.msk.f32.vlgmr.msra.gmra.mrb[4].mxu1 %vm102_vm0, %v85_v58 }
 0x10d   :  { %v971_v3 = vpop.f32.mrb[8].mxu0  ;;  %1052 = vmatpush3.bf16.msra.mxu1 %v1051_v2  ;;  %1006 = vmatprep.mubr.msk.f32.mxu1 %vm1100_vm4, %v1098_v10 }
 0x10e   :  { %v257_v4 = vpop.f32.mrb[9].mxu0  ;;  %1053 = vmatprep.subr.bf16.mxu1 %v1099_v45 }
 0x10f   :  { %v1054_v5 = vpack.c.bf16 %v971_v3, %v257_v4 }
 0x110   :  { %1007 = vmatmul.mubr.msk.f32.vlgmr.msra.gmra.mrb[6].mxu1 %vm102_vm0, %v85_v58 }
 0x111   :  { %v974_v6 = vpop.f32.mrb[10].mxu0  ;;  %1055 = vmatpush3.bf16.msra.mxu1 %v1054_v5  ;;  %1013 = vmatprep.mubr.msk.f32.mxu1 %vm1100_vm4, %v1098_v10 }
 0x112   :  { %v267_v7 = vpop.f32.mrb[11].mxu0  ;;  %1056 = vmatprep.subr.bf16.mxu1 %v1099_v45 }
 0x113   :  { %v1057_v8 = vpack.c.bf16 %v974_v6, %v267_v7 }
 0x114   :  { %1014 = vmatmul.mubr.msk.f32.vlgmr.msra.gmra.mrb[8].mxu1 %vm102_vm0, %v85_v58 }
 0x115   :  { %v977_v9 = vpop.f32.mrb[12].mxu0  ;;  %1058 = vmatpush3.bf16.msra.mxu1 %v1057_v8  ;;  %1020 = vmatprep.mubr.msk.f32.mxu1 %vm1100_vm4, %v1098_v10 }
 0x116   :  { %v277_v11 = vpop.f32.mrb[13].mxu0  ;;  %1059 = vmatprep.subr.bf16.mxu1 %v1099_v45 }
 0x117   :  { %v1060_v12 = vpack.c.bf16 %v977_v9, %v277_v11 }
 0x118   :  { %1021 = vmatmul.mubr.msk.f32.vlgmr.msra.gmra.mrb[10].mxu1 %vm102_vm0, %v85_v58 }
 0x119   :  { %v980_v13 = vpop.f32.mrb[14].mxu0  ;;  %1061 = vmatpush3.bf16.msra.mxu1 %v1060_v12  ;;  %1027 = vmatprep.mubr.msk.f32.mxu1 %vm1100_vm4, %v1098_v10 }
 0x11a   :  { %v287_v14 = vpop.f32.mrb[15].mxu0  ;;  %1062 = vmatprep.subr.bf16.mxu1 %v1099_v45 }
 0x11b   :  { %v1063_v15 = vpack.c.bf16 %v980_v13, %v287_v14 }
 0x11c   :  { %1028 = vmatmul.mubr.msk.f32.vlgmr.msra.gmra.mrb[12].mxu1 %vm102_vm0, %v85_v58 }
 0x11d   :  { %1064 = vmatpush3.bf16.msra.mxu1 %v1063_v15  ;;  %1034 = vmatprep.mubr.msk.f32.mxu1 %vm1100_vm4, %v1098_v10 }
 0x120   :  { %1035 = vmatmul.mubr.msk.f32.vlgmr.msra.gmra.mrb[14].mxu1 %vm102_vm0, %v85_v58 }
 0x1d7   :  { %v365_v16 = vpop.f32.mrb[0].mxu1 }
 0x1d8   :  { %370 = vst.msk [vmem:[%s1218_s1] sm:$0xf] %vm369_vm14, %v365_v16  ;;  %v987_v17 = vpop.f32.mrb[1].mxu1 }
 0x1db   :  { %v437_v18 = vpop.f32.mrb[2].mxu1 }
 0x1dc   :  { %898 = vst.msk [vmem:[%s1218_s1 + $0x4] sm:$0xf] %vm369_vm14, %v437_v18  ;;  %v994_v19 = vpop.f32.mrb[3].mxu1 }
 0x1df   :  { %v509_v20 = vpop.f32.mrb[4].mxu1 }
 0x1e0   :  { %900 = vst.msk [vmem:[%s1218_s1 + $0x8] sm:$0xf] %vm369_vm14, %v509_v20  ;;  %v1001_v10 = vpop.f32.mrb[5].mxu1 }
 0x1e3   :  { %v581_v21 = vpop.f32.mrb[6].mxu1 }
 0x1e4   :  { %902 = vst.msk [vmem:[%s1218_s1 + $0xc] sm:$0xf] %vm369_vm14, %v581_v21  ;;  %v1008_v22 = vpop.f32.mrb[7].mxu1 }
 0x1e7   :  { %v653_v23 = vpop.f32.mrb[8].mxu1 }
 0x1e8   :  { %904 = vst.msk [vmem:[%s1218_s1 + $0x10] sm:$0xf] %vm369_vm14, %v653_v23  ;;  %v1015_v24 = vpop.f32.mrb[9].mxu1 }
 0x1eb   :  { %v725_v25 = vpop.f32.mrb[10].mxu1 }
 0x1ec   :  { %906 = vst.msk [vmem:[%s1218_s1 + $0x14] sm:$0xf] %vm369_vm14, %v725_v25  ;;  %v1022_v26 = vpop.f32.mrb[11].mxu1 }
 0x1ef   :  { %v797_v27 = vpop.f32.mrb[12].mxu1 }
 0x1f0   :  { %908 = vst.msk [vmem:[%s1218_s1 + $0x18] sm:$0xf] %vm369_vm14, %v797_v27  ;;  %v1029_v28 = vpop.f32.mrb[13].mxu1 }
 0x1f3   :  { %v869_v29 = vpop.f32.mrb[14].mxu1 }
 0x1f4   :  { %910 = vst.msk [vmem:[%s1218_s1 + $0x1c] sm:$0xf] %vm369_vm14, %v869_v29  ;;  %v1036_v30 = vpop.f32.mrb[15].mxu1 }
 0x1f5   :  { %879 = vsyncpa [#allocation3], 1 }

</bundles_post_ra>
